<compile_context>
chip_gen: v6e
topology: v6e:2x2x1
jax: 0.10.0
libtpu: 0.0.40
codegen_flags: <defaults>
</compile_context>

<pallas_src>
import math

import jax
import jax.numpy as jnp
from jax.experimental import pallas as pl
from jax.experimental.pallas import tpu as pltpu


_MAX_TILE_BYTES = 2 * 1024 * 1024          # per-array per-tile VMEM budget
_VMEM_LIMIT_BYTES = 32 * 1024 * 1024       # explicit scoped-VMEM limit


def _divisors(n):
    ds = []
    i = 1
    while i * i <= n:
        if n % i == 0:
            ds.append(i)
            if i != n // i:
                ds.append(n // i)
        i += 1
    return sorted(ds)


def _tile_candidates(extent, unit):
    """Divisors of `extent` that are a multiple of `unit` or the full extent
    (both satisfy the (8,128) BlockSpec rule)."""
    return [d for d in _divisors(extent) if (d % unit == 0) or (d == extent)]


def _pick_tile(extent, unit, other_elems, itemsize, max_tile_bytes=_MAX_TILE_BYTES):
    """Largest legal tile along `extent` whose (tile * other_elems) block fits
    the per-array VMEM budget; falls back to the smallest legal tile."""
    candidates = _tile_candidates(extent, unit)
    fitting = [d for d in candidates if d * other_elems * itemsize <= max_tile_bytes]
    if fitting:
        return max(fitting)
    return min(candidates)


# ----------------------------- connect == "add" -----------------------------

def _add_kernel(a_ref, b_ref, o_ref):
    o_ref[...] = a_ref[...] + b_ref[...]


def _skip_connect_add(x_main, x_aux):
    assert x_main.shape == x_aux.shape, "add requires identical shapes"
    orig_shape = x_main.shape
    if x_main.ndim >= 2:
        rows = int(math.prod(orig_shape[:-2])) if len(orig_shape) > 2 else 1
        cols = int(orig_shape[-2] * orig_shape[-1])
    else:
        rows = 1
        cols = int(orig_shape[0]) if orig_shape else 1

    a2 = x_main.reshape(rows, cols)
    b2 = x_aux.reshape(rows, cols)
    itemsize = jnp.dtype(x_main.dtype).itemsize

    # Lane tile first (keep it as wide as possible), then sublane tile.
    tC = _pick_tile(cols, unit=128, other_elems=8, itemsize=itemsize)
    tR = _pick_tile(rows, unit=8, other_elems=tC, itemsize=itemsize)

    out = pl.pallas_call(
        _add_kernel,
        out_shape=jax.ShapeDtypeStruct((rows, cols), x_main.dtype),
        grid_spec=pltpu.PrefetchScalarGridSpec(
            num_scalar_prefetch=0,
            grid=(rows // tR, cols // tC),
            in_specs=[
                pl.BlockSpec((tR, tC), lambda i, j: (i, j)),
                pl.BlockSpec((tR, tC), lambda i, j: (i, j)),
            ],
            out_specs=pl.BlockSpec((tR, tC), lambda i, j: (i, j)),
        ),
        compiler_params=pltpu.CompilerParams(
            dimension_semantics=("parallel", "parallel"),
            vmem_limit_bytes=_VMEM_LIMIT_BYTES,
        ),
    )(a2, b2)
    return out.reshape(orig_shape)


# ----------------------------- connect == "cat" -----------------------------

def _cat2d_kernel(a_ref, b_ref, o_ref):
    cm = a_ref.shape[1]
    o_ref[:, :cm] = a_ref[...]
    o_ref[:, cm:] = b_ref[...]


def _cat3d_kernel(a_ref, b_ref, o_ref):
    cm = a_ref.shape[1]
    o_ref[:, :cm, :] = a_ref[...]
    o_ref[:, cm:, :] = b_ref[...]


def _skip_connect_cat(x_main, x_aux):
    assert x_main.ndim == x_aux.ndim and x_main.ndim >= 2
    assert x_main.shape[0] == x_aux.shape[0]
    assert x_main.shape[2:] == x_aux.shape[2:]
    B = int(x_main.shape[0])
    Cm, Ca = int(x_main.shape[1]), int(x_aux.shape[1])
    spatial = x_main.shape[2:]
    S = int(math.prod(spatial)) if spatial else 1
    itemsize = jnp.dtype(x_main.dtype).itemsize
    out_shape = (B, Cm + Ca) + tuple(spatial)

    CmS, CaS = Cm * S, Ca * S
    min_tB = min(_tile_candidates(B, unit=8))
    lane_aligned = (CmS % 128 == 0) and (CaS % 128 == 0)
    fits_2d = min_tB * (CmS + CaS) * itemsize <= _MAX_TILE_BYTES

    if lane_aligned and fits_2d:
        # Fully lane-dense path: one row per batch element, channel*spatial on
        # the lane axis; both copy offsets (0 and CmS) are 128-aligned.
        a2 = x_main.reshape(B, CmS)
        b2 = x_aux.reshape(B, CaS)
        tB = _pick_tile(B, unit=8, other_elems=(CmS + CaS), itemsize=itemsize)

        out = pl.pallas_call(
            _cat2d_kernel,
            out_shape=jax.ShapeDtypeStruct((B, CmS + CaS), x_main.dtype),
            grid_spec=pltpu.PrefetchScalarGridSpec(
                num_scalar_prefetch=0,
                grid=(B // tB,),
                in_specs=[
                    pl.BlockSpec((tB, CmS), lambda b: (b, 0)),
                    pl.BlockSpec((tB, CaS), lambda b: (b, 0)),
                ],
                out_specs=pl.BlockSpec((tB, CmS + CaS), lambda b: (b, 0)),
            ),
            compiler_params=pltpu.CompilerParams(
                dimension_semantics=("parallel",),
                vmem_limit_bytes=_VMEM_LIMIT_BYTES,
            ),
        )(a2, b2)
        return out.reshape(out_shape)

    # Fallback: (B, C, S) tiling — channel axis is always the full extent,
    # spatial axis tiled in lane units of 128.
    a3 = x_main.reshape(B, Cm, S)
    b3 = x_aux.reshape(B, Ca, S)
    tS = _pick_tile(S, unit=128, other_elems=(Cm + Ca), itemsize=itemsize)
    tB = _pick_tile(B, unit=1, other_elems=(Cm + Ca) * tS, itemsize=itemsize)

    out = pl.pallas_call(
        _cat3d_kernel,
        out_shape=jax.ShapeDtypeStruct((B, Cm + Ca, S), x_main.dtype),
        grid_spec=pltpu.PrefetchScalarGridSpec(
            num_scalar_prefetch=0,
            grid=(B // tB, S // tS),
            in_specs=[
                pl.BlockSpec((tB, Cm, tS), lambda b, s: (b, 0, s)),
                pl.BlockSpec((tB, Ca, tS), lambda b, s: (b, 0, s)),
            ],
            out_specs=pl.BlockSpec((tB, Cm + Ca, tS), lambda b, s: (b, 0, s)),
        ),
        compiler_params=pltpu.CompilerParams(
            dimension_semantics=("parallel", "parallel"),
            vmem_limit_bytes=_VMEM_LIMIT_BYTES,
        ),
    )(a3, b3)
    return out.reshape(out_shape)


# --------------------------------- wrapper ----------------------------------

def skip_connect(x_main, x_aux, connect):
    """JAX/Pallas equivalent of Skip_connect.forward."""
    if connect == "add":
        return _skip_connect_add(x_main, x_aux)
    elif connect == "cat":
        return _skip_connect_cat(x_main, x_aux)
    else:
        raise ValueError(f"unknown connect mode: {connect!r}")


if __name__ == "__main__":
    key = jax.random.PRNGKey(0)
    k1, k2 = jax.random.split(key)
    B, C, H, W = 2, 4, 16, 16
    x_main = jax.random.normal(k1, (B, C, H, W), dtype=jnp.float32)
    x_aux = jax.random.normal(k2, (B, C, H, W), dtype=jnp.float32)

    out_add = jax.block_until_ready(skip_connect(x_main, x_aux, connect="add"))
    out_cat = jax.block_until_ready(skip_connect(x_main, x_aux, connect="cat"))

    ref_add = x_main + x_aux
    ref_cat = jnp.concatenate([x_main, x_aux], axis=1)

    assert out_add.shape == (B, C, H, W)
    assert out_cat.shape == (B, 2 * C, H, W)
    assert jnp.allclose(out_add, ref_add, atol=1e-6, rtol=1e-6)
    assert jnp.allclose(out_cat, ref_cat, atol=1e-6, rtol=1e-6)

    # Exercise the 3D fallback path for "cat" (spatial extent not 128-aligned).
    x3m = jax.random.normal(k1, (2, 3, 5, 12), dtype=jnp.float32)
    x3a = jax.random.normal(k2, (2, 5, 5, 12), dtype=jnp.float32)
    out_cat2 = jax.block_until_ready(skip_connect(x3m, x3a, connect="cat"))
    ref_cat2 = jnp.concatenate([x3m, x3a], axis=1)
    assert out_cat2.shape == (2, 8, 5, 12)
    assert jnp.allclose(out_cat2, ref_cat2, atol=1e-6, rtol=1e-6)

    print("KERNEL_OK")
</pallas_src>

<mosaic_0001>
module attributes {stable_mosaic.version = 11 : i64} {
  func.func @_add_kernel(%arg0: i32, %arg1: i32, %arg2: memref<8x256xf32, #tpu.memory_space<vmem>>, %arg3: memref<8x256xf32, #tpu.memory_space<vmem>>, %arg4: memref<8x256xf32, #tpu.memory_space<vmem>>) attributes {dimension_semantics = [#tpu.dimension_semantics<parallel>, #tpu.dimension_semantics<parallel>], iteration_bounds = array<i64: 1, 1>, scalar_prefetch = 0 : i64, scratch_operands = 0 : i64, tpu.core_type = #tpu.core_type<tc>, window_params = [{transform_indices = @transform_0, window_bounds = array<i64: 8, 256>}, {transform_indices = @transform_1, window_bounds = array<i64: 8, 256>}, {transform_indices = @transform_2, window_bounds = array<i64: 8, 256>}]} {
    %c0 = arith.constant 0 : index
    %c0_0 = arith.constant 0 : index
    %0 = vector.load %arg2[%c0, %c0_0] : memref<8x256xf32, #tpu.memory_space<vmem>>, vector<8x256xf32>
    %c0_1 = arith.constant 0 : index
    %c0_2 = arith.constant 0 : index
    %1 = vector.load %arg3[%c0_1, %c0_2] : memref<8x256xf32, #tpu.memory_space<vmem>>, vector<8x256xf32>
    %2 = arith.addf %0, %1 : vector<8x256xf32>
    %c0_3 = arith.constant 0 : index
    %c0_4 = arith.constant 0 : index
    %3 = vector.load %arg4[%c0_3, %c0_4] : memref<8x256xf32, #tpu.memory_space<vmem>>, vector<8x256xf32>
    tpu.vector_store %arg4[%c0_3, %c0_4], %2 {strides = array<i32>} : memref<8x256xf32, #tpu.memory_space<vmem>>, vector<8x256xf32>,
    return
  }
  func.func @transform_0(%arg0: i32, %arg1: i32) -> (i32, i32) {
    %c0_i32 = arith.constant 0 : i32
    return %arg0, %arg1 : i32, i32
  }
  func.func @transform_1(%arg0: i32, %arg1: i32) -> (i32, i32) {
    %c0_i32 = arith.constant 0 : i32
    return %arg0, %arg1 : i32, i32
  }
  func.func @transform_2(%arg0: i32, %arg1: i32) -> (i32, i32) {
    %c0_i32 = arith.constant 0 : i32
    return %arg0, %arg1 : i32, i32
  }
}

</mosaic_0001>

<bundles_post_ra>
// kernel: tpu_custom_call.1
= control target key start
LH: loop header
LB: loop body
LE: loop exit
PB: predicated region body
PF: predicated region fallthrough
CT: control target
= control target key end

     0   :  { %7 = vsyncpa [#allocation3], 0  ;;  %s156_s0 = inlined_call_operand.hbm [shape: f32[8,256], index: 0, kind: input, shape index: {}]   ;;  %s157_s1 = inlined_call_operand.hbm [shape: f32[8,256], index: 1, kind: input, shape index: {}]   ;;  %s158_s2 = inlined_call_operand.hbm [shape: f32[8,256], index: 2, kind: output, shape index: {}]  }
   0x1   :  { %8 = vsyncpa [#allocation6], 0 }
   0x2   :  { %9 = vsyncpa [#allocation4], 0  ;;  %s129_s9 = smov [#allocation2]   ;;  %s130_s11 = smov [#allocation5]  }
   0x3   :  { %s16_s10 = sshll.u32 %s129_s9, 4  ;;  %s26_s12 = sshll.u32 %s130_s11, 4  ;;  %s17_s10 = int_to_ptr.vmem [resolvable:$true] %s16_s10  ;;  %s27_s12 = int_to_ptr.vmem [resolvable:$true] %s26_s12 }
   0x4   :  { %s71_s13 = scalar_lea.vmem %s17_s10, 256  ;;  %p76_p1 = scmp.lt.s32.totalorder %s17_s10, %s17_s10 }
   0x5   :  { %p72_p0 = scmp.ne.s32.totalorder %s17_s10, %s71_s13  ;;  %p77_p2 = scmp.lt.s32.totalorder %s71_s13, %s71_s13 }
   0x7   :  { %p78_p3 = por %p77_p2, %p76_p1 }
   0x9   :  { %p79_p4 = pnand %p78_p3, %p72_p0 }
   0xb   :  { %82 = shalt.err (!%p79_p4)
}
   0xc   :  { %19 = dma.hbm_to_vmem [thread:$0]  %s156_s0, 256, %s17_s10, [#allocation3]  }
   0xd   :  { %s91_s16 = scalar_lea.vmem %s27_s12, 256  ;;  %p96_p6 = scmp.lt.s32.totalorder %s27_s12, %s27_s12 }
   0xe   :  { %p92_p5 = scmp.ne.s32.totalorder %s27_s12, %s91_s16  ;;  %p97_p7 = scmp.lt.s32.totalorder %s91_s16, %s91_s16 }
  0x10   :  { %p98_p8 = por %p97_p7, %p96_p6 }
  0x12   :  { %p99_p9 = pnand %p98_p8, %p92_p5 }
  0x14   :  { %102 = shalt.err (!%p99_p9)
}
  0x15   :  { %29 = dma.hbm_to_vmem [thread:$0]  %s157_s1, 256, %s27_s12, [#allocation6]  }
  0x16   :  { %123 = dma.done.wait [#allocation3], 256  }
  0x17   :  { %124 = vsyncadd [#allocation3], 4294967040 }
  0x18   :  { %125 = dma.done.wait [#allocation6], 256  }
  0x19   :  { %126 = vsyncadd [#allocation6], 4294967040  ;;  %s131_s19 = smov [#allocation7]   ;;  %v36_v0 = vld [vmem:[#allocation2] sm:$0xff]  ;;  %v38_v1 = vld [vmem:[#allocation5] sm:$0xff] }
  0x1a   :  { %s50_s20 = sshll.u32 %s131_s19, 4  ;;  %v37_v2 = vld [vmem:[#allocation2 + $0x8] sm:$0xff]  ;;  %v40_v3 = vadd.f32 %v38_v1, %v36_v0  ;;  %v39_v4 = vld [vmem:[#allocation5 + $0x8] sm:$0xff]  ;;  %s51_s20 = int_to_ptr.vmem [resolvable:$true] %s50_s20 }
  0x1b   :  { %v41_v5 = vadd.f32 %v39_v4, %v37_v2  ;;  %s103_s0 = scalar_lea.vmem %s51_s20, 256  ;;  %p108_p11 = scmp.lt.s32.totalorder %s51_s20, %s51_s20 }
  0x1c   :  { %42 = vst [vmem:[#allocation7] sm:$0xff] %v40_v3  ;;  %p104_p10 = scmp.ne.s32.totalorder %s51_s20, %s103_s0  ;;  %p109_p12 = scmp.lt.s32.totalorder %s103_s0, %s103_s0 }
  0x1d   :  { %43 = vst [vmem:[#allocation7 + $0x8] sm:$0xff] %v41_v5 }
  0x1e   :  { %p110_p13 = por %p109_p12, %p108_p11 }
  0x20   :  { %p111_p0 = pnand %p110_p13, %p104_p10 }
  0x22   :  { %114 = shalt.err (!%p111_p0)
}
  0x23   :  { %53 = dma.vmem_to_hbm [thread:$0]  %s51_s20, 256, %s158_s2, [#allocation4]  }
  0x24   :  { %127 = dma.done.wait [#allocation4], 256  }
  0x25   :  { %128 = vsyncadd [#allocation4], 4294967040 }
  0x26   :  { %57 = vsyncpa [#allocation3], 1 }
  0x27   :  { %58 = vsyncpa [#allocation6], 1 }
  0x28   :  { %59 = vsyncpa [#allocation4], 1 }

</bundles_post_ra>
